<compile_context>
chip_gen: v7x
topology: tpu7x:2x2x1
jax: 0.10.0
libtpu: 0.0.40
codegen_flags: <defaults>
</compile_context>

<pallas_src>
import functools

import jax
import jax.numpy as jnp
from jax import lax
from jax.experimental import pallas as pl
from jax.experimental.pallas import tpu as pltpu


def _silu(x):
    return x * jax.nn.sigmoid(x)


def bottleneck_kernel(x_ref, mask_ref, w1_ref, b1_ref, w2_ref, b2_ref, o_ref,
                      *, W, add):
    # x_ref:    (C1, HW)        one batch element, spatial flattened on lanes
    # mask_ref: (9, HW)         per-tap zero-padding masks (1.0 inside image)
    # w1_ref:   (Cmid, C1)      folded 1x1 conv weight
    # b1_ref:   (Cmid, 1)       folded 1x1 conv bias
    # w2_ref:   (C2, 9*Cmid)    folded 3x3 conv weight, [(di+1)*3+(dj+1)]*Cmid+cm
    # b2_ref:   (C2, 1)         folded 3x3 conv bias
    # o_ref:    (C2, HW)
    C1, HW = x_ref.shape
    Cmid = w1_ref.shape[0]

    x = x_ref[...]          # (C1, HW) f32, lane-dense
    w1 = w1_ref[...]        # (Cmid, C1)
    w2 = w2_ref[...]        # (C2, 9*Cmid)

    # ---- cv1: 1x1 conv as C1 VPU broadcast-FMAs (channels too small for MXU)
    acc1 = w1[:, 0:1] * x[0:1, :]
    for c1 in range(1, C1):
        acc1 = acc1 + w1[:, c1:c1 + 1] * x[c1:c1 + 1, :]
    y1 = _silu(acc1 + b1_ref[...])          # (Cmid, HW)

    # ---- cv2: 3x3 conv via 9 lane-rolled taps + boundary masks (no scratch)
    acc2 = None
    for di in (-1, 0, 1):
        for dj in (-1, 0, 1):
            off = di * W + dj               # flattened spatial offset of tap
            t = (di + 1) * 3 + (dj + 1)     # tap index 0..8
            if off == 0:
                tap = y1
            else:
                # tap[:, idx] = y1[:, idx + off]   (wrap-around killed by mask)
                tap = pltpu.roll(y1, shift=(-off) % HW, axis=1)
                tap = tap * mask_ref[t:t + 1, :]     # zero-padding outside image
            for cm in range(Cmid):
                k = t * Cmid + cm
                term = w2[:, k:k + 1] * tap[cm:cm + 1, :]   # (C2,1)*(1,HW)
                acc2 = term if acc2 is None else acc2 + term
    y2 = _silu(acc2 + b2_ref[...])          # (C2, HW)

    # ---- optional residual add, single lane-dense store ----
    o_ref[...] = (x + y2) if add else y2


def bottleneck_pallas(x_flat, masks, w1, b1, w2, b2, *, W, add):
    B, C1, HW = x_flat.shape
    Cmid = w1.shape[0]
    C2 = w2.shape[0]

    kernel = functools.partial(bottleneck_kernel, W=W, add=add)
    return pl.pallas_call(
        kernel,
        out_shape=jax.ShapeDtypeStruct((B, C2, HW), jnp.float32),
        grid_spec=pltpu.PrefetchScalarGridSpec(
            num_scalar_prefetch=0,
            grid=(B,),
            in_specs=[
                pl.BlockSpec((None, C1, HW), lambda b: (b, 0, 0)),
                pl.BlockSpec((9, HW), lambda b: (0, 0)),
                pl.BlockSpec((Cmid, C1), lambda b: (0, 0)),
                pl.BlockSpec((Cmid, 1), lambda b: (0, 0)),
                pl.BlockSpec((C2, 9 * Cmid), lambda b: (0, 0)),
                pl.BlockSpec((C2, 1), lambda b: (0, 0)),
            ],
            out_specs=pl.BlockSpec((None, C2, HW), lambda b: (b, 0, 0)),
        ),
        compiler_params=pltpu.CompilerParams(dimension_semantics=("parallel",)),
    )(x_flat, masks, w1, b1, w2, b2)


def _make_tap_masks(H, W):
    """(9, H*W) f32 masks: 1.0 where tap (di,dj) reads inside the image."""
    ii = jnp.arange(H).reshape(H, 1)
    jj = jnp.arange(W).reshape(1, W)
    rows = []
    for di in (-1, 0, 1):
        for dj in (-1, 0, 1):
            valid = ((ii + di >= 0) & (ii + di < H)
                     & (jj + dj >= 0) & (jj + dj < W))
            rows.append(valid.reshape(H * W))
    return jnp.stack(rows, axis=0).astype(jnp.float32)


def _fold_bn(w_oihw, gamma, beta, mean, var, eps=1e-5):
    scale = gamma / jnp.sqrt(var + eps)
    w_f = w_oihw * scale[:, None, None, None]
    b_f = beta - mean * scale
    return w_f, b_f


def _ref_bottleneck_nchw(x, w1_oihw, b1, w2_oihw, b2, add):
    dn = ("NCHW", "OIHW", "NCHW")
    y = lax.conv_general_dilated(x, w1_oihw, (1, 1), "SAME", dimension_numbers=dn)
    y = _silu(y + b1[None, :, None, None])
    y = lax.conv_general_dilated(y, w2_oihw, (1, 1), "SAME", dimension_numbers=dn)
    y = _silu(y + b2[None, :, None, None])
    return x + y if add else y


if __name__ == "__main__":
    # Bottleneck(c1=4, c2=4, shortcut=True, e=0.5)  -> c_ = 2, add = True
    c1, c2, e, shortcut = 4, 4, 0.5, True
    c_mid = int(c2 * e)
    add = shortcut and (c1 == c2)

    B, H, W = 2, 16, 16
    key = jax.random.PRNGKey(0)
    keys = jax.random.split(key, 12)

    x_nchw = jax.random.normal(keys[0], (B, c1, H, W), jnp.float32)

    # cv1 params (conv weight OIHW + BN)
    w1_oihw = jax.random.normal(keys[1], (c_mid, c1, 1, 1), jnp.float32) * 0.5
    g1 = 0.5 + jax.random.uniform(keys[2], (c_mid,), jnp.float32)
    beta1 = jax.random.normal(keys[3], (c_mid,), jnp.float32) * 0.1
    mean1 = jax.random.normal(keys[4], (c_mid,), jnp.float32) * 0.1
    var1 = 0.5 + jax.random.uniform(keys[5], (c_mid,), jnp.float32)

    # cv2 params
    w2_oihw = jax.random.normal(keys[6], (c2, c_mid, 3, 3), jnp.float32) * 0.3
    g2 = 0.5 + jax.random.uniform(keys[7], (c2,), jnp.float32)
    beta2 = jax.random.normal(keys[8], (c2,), jnp.float32) * 0.1
    mean2 = jax.random.normal(keys[9], (c2,), jnp.float32) * 0.1
    var2 = 0.5 + jax.random.uniform(keys[10], (c2,), jnp.float32)

    # Fold BatchNorm (eval mode) into conv weights.
    w1f, b1f = _fold_bn(w1_oihw, g1, beta1, mean1, var1)
    w2f, b2f = _fold_bn(w2_oihw, g2, beta2, mean2, var2)

    # Kernel-layout parameters (channels on sublanes, spatial on lanes).
    w1_k = w1f[:, :, 0, 0]                                   # (Cmid, C1)
    b1_k = b1f.reshape(c_mid, 1)                             # (Cmid, 1)
    w2_k = jnp.transpose(w2f, (0, 2, 3, 1)).reshape(c2, 9 * c_mid)  # (C2, 9*Cmid)
    b2_k = b2f.reshape(c2, 1)                                # (C2, 1)
    masks = _make_tap_masks(H, W)                            # (9, H*W)

    # NCHW -> (B, C, H*W): pure reshape, no transpose needed for this layout.
    x_flat = x_nchw.reshape(B, c1, H * W)

    out_flat = bottleneck_pallas(x_flat, masks, w1_k, b1_k, w2_k, b2_k,
                                 W=W, add=add)
    out_nchw = out_flat.reshape(B, c2, H, W)
    jax.block_until_ready(out_nchw)

    # Correctness check against pure-JAX (XLA conv) reference.
    ref = _ref_bottleneck_nchw(x_nchw, w1f, b1f, w2f, b2f, add)
    assert out_nchw.shape == (B, c2, H, W)
    assert jnp.allclose(out_nchw, ref, atol=1e-4, rtol=1e-4), float(
        jnp.max(jnp.abs(out_nchw - ref))
    )

    print("KERNEL_OK")
</pallas_src>

<mosaic_0001>
module attributes {stable_mosaic.version = 11 : i64} {
  func.func @bottleneck_kernel(%arg0: i32, %arg1: memref<1x4x256xf32, #tpu.memory_space<vmem>>, %arg2: memref<9x256xf32, #tpu.memory_space<vmem>>, %arg3: memref<2x4xf32, #tpu.memory_space<vmem>>, %arg4: memref<2x1xf32, #tpu.memory_space<vmem>>, %arg5: memref<4x18xf32, #tpu.memory_space<vmem>>, %arg6: memref<4x1xf32, #tpu.memory_space<vmem>>, %arg7: memref<1x4x256xf32, #tpu.memory_space<vmem>>) attributes {dimension_semantics = [#tpu.dimension_semantics<parallel>], iteration_bounds = array<i64: 2>, scalar_prefetch = 0 : i64, scratch_operands = 0 : i64, tpu.core_type = #tpu.core_type<tc>, window_params = [{transform_indices = @transform_0, window_bounds = array<i64: 1, 4, 256>}, {pipeline_mode = #tpu.pipeline_mode<synchronous>, transform_indices = @transform_1, window_bounds = array<i64: 9, 256>}, {pipeline_mode = #tpu.pipeline_mode<synchronous>, transform_indices = @transform_2, window_bounds = array<i64: 2, 4>}, {pipeline_mode = #tpu.pipeline_mode<synchronous>, transform_indices = @transform_3, window_bounds = array<i64: 2, 1>}, {pipeline_mode = #tpu.pipeline_mode<synchronous>, transform_indices = @transform_4, window_bounds = array<i64: 4, 18>}, {pipeline_mode = #tpu.pipeline_mode<synchronous>, transform_indices = @transform_5, window_bounds = array<i64: 4, 1>}, {transform_indices = @transform_6, window_bounds = array<i64: 1, 4, 256>}]} {
    %c0 = arith.constant 0 : index
    %c0_0 = arith.constant 0 : index
    %c0_1 = arith.constant 0 : index
    %0 = vector.load %arg1[%c0, %c0_0, %c0_1] : memref<1x4x256xf32, #tpu.memory_space<vmem>>, vector<1x4x256xf32>
    %1 = vector.shape_cast %0 : vector<1x4x256xf32> to vector<4x256xf32>
    %c0_2 = arith.constant 0 : index
    %c0_3 = arith.constant 0 : index
    %2 = vector.load %arg3[%c0_2, %c0_3] : memref<2x4xf32, #tpu.memory_space<vmem>>, vector<2x4xf32>
    %c0_4 = arith.constant 0 : index
    %c0_5 = arith.constant 0 : index
    %3 = vector.load %arg5[%c0_4, %c0_5] : memref<4x18xf32, #tpu.memory_space<vmem>>, vector<4x18xf32>
    %4 = vector.extract_strided_slice %2 {offsets = [0, 0], sizes = [2, 1], strides = [1, 1]} : vector<2x4xf32> to vector<2x1xf32>
    %5 = vector.extract_strided_slice %1 {offsets = [0, 0], sizes = [1, 256], strides = [1, 1]} : vector<4x256xf32> to vector<1x256xf32>
    %6 = vector.broadcast %4 : vector<2x1xf32> to vector<2x256xf32>
    %7 = vector.broadcast %5 : vector<1x256xf32> to vector<2x256xf32>
    %8 = arith.mulf %6, %7 : vector<2x256xf32>
    %9 = vector.extract_strided_slice %2 {offsets = [0, 1], sizes = [2, 1], strides = [1, 1]} : vector<2x4xf32> to vector<2x1xf32>
    %10 = vector.extract_strided_slice %1 {offsets = [1, 0], sizes = [1, 256], strides = [1, 1]} : vector<4x256xf32> to vector<1x256xf32>
    %11 = vector.broadcast %9 : vector<2x1xf32> to vector<2x256xf32>
    %12 = vector.broadcast %10 : vector<1x256xf32> to vector<2x256xf32>
    %13 = arith.mulf %11, %12 : vector<2x256xf32>
    %14 = arith.addf %8, %13 : vector<2x256xf32>
    %15 = vector.extract_strided_slice %2 {offsets = [0, 2], sizes = [2, 1], strides = [1, 1]} : vector<2x4xf32> to vector<2x1xf32>
    %16 = vector.extract_strided_slice %1 {offsets = [2, 0], sizes = [1, 256], strides = [1, 1]} : vector<4x256xf32> to vector<1x256xf32>
    %17 = vector.broadcast %15 : vector<2x1xf32> to vector<2x256xf32>
    %18 = vector.broadcast %16 : vector<1x256xf32> to vector<2x256xf32>
    %19 = arith.mulf %17, %18 : vector<2x256xf32>
    %20 = arith.addf %14, %19 : vector<2x256xf32>
    %21 = vector.extract_strided_slice %2 {offsets = [0, 3], sizes = [2, 1], strides = [1, 1]} : vector<2x4xf32> to vector<2x1xf32>
    %22 = vector.extract_strided_slice %1 {offsets = [3, 0], sizes = [1, 256], strides = [1, 1]} : vector<4x256xf32> to vector<1x256xf32>
    %23 = vector.broadcast %21 : vector<2x1xf32> to vector<2x256xf32>
    %24 = vector.broadcast %22 : vector<1x256xf32> to vector<2x256xf32>
    %25 = arith.mulf %23, %24 : vector<2x256xf32>
    %26 = arith.addf %20, %25 : vector<2x256xf32>
    %c0_6 = arith.constant 0 : index
    %c0_7 = arith.constant 0 : index
    %27 = vector.load %arg4[%c0_6, %c0_7] : memref<2x1xf32, #tpu.memory_space<vmem>>, vector<2x1xf32>
    %28 = vector.broadcast %27 : vector<2x1xf32> to vector<2x256xf32>
    %29 = arith.addf %26, %28 : vector<2x256xf32>
    %30 = arith.negf %29 : vector<2x256xf32>
    %31 = math.exp %30 : vector<2x256xf32>
    %cst = arith.constant 1.000000e+00 : f32
    %32 = vector.broadcast %cst : f32 to vector<2x256xf32>
    %33 = arith.addf %32, %31 : vector<2x256xf32>
    %34 = arith.divf %32, %33 : vector<2x256xf32>
    %35 = arith.mulf %29, %34 : vector<2x256xf32>
    %c17_i32 = arith.constant 17 : i32
    %36 = tpu.dynamic_rotate %35 by %c17_i32 dim 1 : vector<2x256xf32>, i32 -> vector<2x256xf32>
    %c0_8 = arith.constant 0 : index
    %c0_9 = arith.constant 0 : index
    %37 = vector.load %arg2[%c0_8, %c0_9] : memref<9x256xf32, #tpu.memory_space<vmem>>, vector<1x256xf32>
    %38 = vector.broadcast %37 : vector<1x256xf32> to vector<2x256xf32>
    %39 = arith.mulf %36, %38 : vector<2x256xf32>
    %40 = vector.extract_strided_slice %3 {offsets = [0, 0], sizes = [4, 1], strides = [1, 1]} : vector<4x18xf32> to vector<4x1xf32>
    %41 = vector.extract_strided_slice %39 {offsets = [0, 0], sizes = [1, 256], strides = [1, 1]} : vector<2x256xf32> to vector<1x256xf32>
    %42 = vector.broadcast %40 : vector<4x1xf32> to vector<4x256xf32>
    %43 = vector.broadcast %41 : vector<1x256xf32> to vector<4x256xf32>
    %44 = arith.mulf %42, %43 : vector<4x256xf32>
    %45 = vector.extract_strided_slice %3 {offsets = [0, 1], sizes = [4, 1], strides = [1, 1]} : vector<4x18xf32> to vector<4x1xf32>
    %46 = vector.extract_strided_slice %39 {offsets = [1, 0], sizes = [1, 256], strides = [1, 1]} : vector<2x256xf32> to vector<1x256xf32>
    %47 = vector.broadcast %45 : vector<4x1xf32> to vector<4x256xf32>
    %48 = vector.broadcast %46 : vector<1x256xf32> to vector<4x256xf32>
    %49 = arith.mulf %47, %48 : vector<4x256xf32>
    %50 = arith.addf %44, %49 : vector<4x256xf32>
    %c16_i32 = arith.constant 16 : i32
    %51 = tpu.dynamic_rotate %35 by %c16_i32 dim 1 : vector<2x256xf32>, i32 -> vector<2x256xf32>
    %c1 = arith.constant 1 : index
    %c0_10 = arith.constant 0 : index
    %52 = vector.load %arg2[%c1, %c0_10] : memref<9x256xf32, #tpu.memory_space<vmem>>, vector<1x256xf32>
    %53 = vector.broadcast %52 : vector<1x256xf32> to vector<2x256xf32>
    %54 = arith.mulf %51, %53 : vector<2x256xf32>
    %55 = vector.extract_strided_slice %3 {offsets = [0, 2], sizes = [4, 1], strides = [1, 1]} : vector<4x18xf32> to vector<4x1xf32>
    %56 = vector.extract_strided_slice %54 {offsets = [0, 0], sizes = [1, 256], strides = [1, 1]} : vector<2x256xf32> to vector<1x256xf32>
    %57 = vector.broadcast %55 : vector<4x1xf32> to vector<4x256xf32>
    %58 = vector.broadcast %56 : vector<1x256xf32> to vector<4x256xf32>
    %59 = arith.mulf %57, %58 : vector<4x256xf32>
    %60 = arith.addf %50, %59 : vector<4x256xf32>
    %61 = vector.extract_strided_slice %3 {offsets = [0, 3], sizes = [4, 1], strides = [1, 1]} : vector<4x18xf32> to vector<4x1xf32>
    %62 = vector.extract_strided_slice %54 {offsets = [1, 0], sizes = [1, 256], strides = [1, 1]} : vector<2x256xf32> to vector<1x256xf32>
    %63 = vector.broadcast %61 : vector<4x1xf32> to vector<4x256xf32>
    %64 = vector.broadcast %62 : vector<1x256xf32> to vector<4x256xf32>
    %65 = arith.mulf %63, %64 : vector<4x256xf32>
    %66 = arith.addf %60, %65 : vector<4x256xf32>
    %c15_i32 = arith.constant 15 : i32
    %67 = tpu.dynamic_rotate %35 by %c15_i32 dim 1 : vector<2x256xf32>, i32 -> vector<2x256xf32>
    %c2 = arith.constant 2 : index
    %c0_11 = arith.constant 0 : index
    %68 = vector.load %arg2[%c2, %c0_11] : memref<9x256xf32, #tpu.memory_space<vmem>>, vector<1x256xf32>
    %69 = vector.broadcast %68 : vector<1x256xf32> to vector<2x256xf32>
    %70 = arith.mulf %67, %69 : vector<2x256xf32>
    %71 = vector.extract_strided_slice %3 {offsets = [0, 4], sizes = [4, 1], strides = [1, 1]} : vector<4x18xf32> to vector<4x1xf32>
    %72 = vector.extract_strided_slice %70 {offsets = [0, 0], sizes = [1, 256], strides = [1, 1]} : vector<2x256xf32> to vector<1x256xf32>
    %73 = vector.broadcast %71 : vector<4x1xf32> to vector<4x256xf32>
    %74 = vector.broadcast %72 : vector<1x256xf32> to vector<4x256xf32>
    %75 = arith.mulf %73, %74 : vector<4x256xf32>
    %76 = arith.addf %66, %75 : vector<4x256xf32>
    %77 = vector.extract_strided_slice %3 {offsets = [0, 5], sizes = [4, 1], strides = [1, 1]} : vector<4x18xf32> to vector<4x1xf32>
    %78 = vector.extract_strided_slice %70 {offsets = [1, 0], sizes = [1, 256], strides = [1, 1]} : vector<2x256xf32> to vector<1x256xf32>
    %79 = vector.broadcast %77 : vector<4x1xf32> to vector<4x256xf32>
    %80 = vector.broadcast %78 : vector<1x256xf32> to vector<4x256xf32>
    %81 = arith.mulf %79, %80 : vector<4x256xf32>
    %82 = arith.addf %76, %81 : vector<4x256xf32>
    %c1_i32 = arith.constant 1 : i32
    %83 = tpu.dynamic_rotate %35 by %c1_i32 dim 1 : vector<2x256xf32>, i32 -> vector<2x256xf32>
    %c3 = arith.constant 3 : index
    %c0_12 = arith.constant 0 : index
    %84 = vector.load %arg2[%c3, %c0_12] : memref<9x256xf32, #tpu.memory_space<vmem>>, vector<1x256xf32>
    %85 = vector.broadcast %84 : vector<1x256xf32> to vector<2x256xf32>
    %86 = arith.mulf %83, %85 : vector<2x256xf32>
    %87 = vector.extract_strided_slice %3 {offsets = [0, 6], sizes = [4, 1], strides = [1, 1]} : vector<4x18xf32> to vector<4x1xf32>
    %88 = vector.extract_strided_slice %86 {offsets = [0, 0], sizes = [1, 256], strides = [1, 1]} : vector<2x256xf32> to vector<1x256xf32>
    %89 = vector.broadcast %87 : vector<4x1xf32> to vector<4x256xf32>
    %90 = vector.broadcast %88 : vector<1x256xf32> to vector<4x256xf32>
    %91 = arith.mulf %89, %90 : vector<4x256xf32>
    %92 = arith.addf %82, %91 : vector<4x256xf32>
    %93 = vector.extract_strided_slice %3 {offsets = [0, 7], sizes = [4, 1], strides = [1, 1]} : vector<4x18xf32> to vector<4x1xf32>
    %94 = vector.extract_strided_slice %86 {offsets = [1, 0], sizes = [1, 256], strides = [1, 1]} : vector<2x256xf32> to vector<1x256xf32>
    %95 = vector.broadcast %93 : vector<4x1xf32> to vector<4x256xf32>
    %96 = vector.broadcast %94 : vector<1x256xf32> to vector<4x256xf32>
    %97 = arith.mulf %95, %96 : vector<4x256xf32>
    %98 = arith.addf %92, %97 : vector<4x256xf32>
    %99 = vector.extract_strided_slice %3 {offsets = [0, 8], sizes = [4, 1], strides = [1, 1]} : vector<4x18xf32> to vector<4x1xf32>
    %100 = vector.extract_strided_slice %35 {offsets = [0, 0], sizes = [1, 256], strides = [1, 1]} : vector<2x256xf32> to vector<1x256xf32>
    %101 = vector.broadcast %99 : vector<4x1xf32> to vector<4x256xf32>
    %102 = vector.broadcast %100 : vector<1x256xf32> to vector<4x256xf32>
    %103 = arith.mulf %101, %102 : vector<4x256xf32>
    %104 = arith.addf %98, %103 : vector<4x256xf32>
    %105 = vector.extract_strided_slice %3 {offsets = [0, 9], sizes = [4, 1], strides = [1, 1]} : vector<4x18xf32> to vector<4x1xf32>
    %106 = vector.extract_strided_slice %35 {offsets = [1, 0], sizes = [1, 256], strides = [1, 1]} : vector<2x256xf32> to vector<1x256xf32>
    %107 = vector.broadcast %105 : vector<4x1xf32> to vector<4x256xf32>
    %108 = vector.broadcast %106 : vector<1x256xf32> to vector<4x256xf32>
    %109 = arith.mulf %107, %108 : vector<4x256xf32>
    %110 = arith.addf %104, %109 : vector<4x256xf32>
    %c255_i32 = arith.constant 255 : i32
    %111 = tpu.dynamic_rotate %35 by %c255_i32 dim 1 : vector<2x256xf32>, i32 -> vector<2x256xf32>
    %c5 = arith.constant 5 : index
    %c0_13 = arith.constant 0 : index
    %112 = vector.load %arg2[%c5, %c0_13] : memref<9x256xf32, #tpu.memory_space<vmem>>, vector<1x256xf32>
    %113 = vector.broadcast %112 : vector<1x256xf32> to vector<2x256xf32>
    %114 = arith.mulf %111, %113 : vector<2x256xf32>
    %115 = vector.extract_strided_slice %3 {offsets = [0, 10], sizes = [4, 1], strides = [1, 1]} : vector<4x18xf32> to vector<4x1xf32>
    %116 = vector.extract_strided_slice %114 {offsets = [0, 0], sizes = [1, 256], strides = [1, 1]} : vector<2x256xf32> to vector<1x256xf32>
    %117 = vector.broadcast %115 : vector<4x1xf32> to vector<4x256xf32>
    %118 = vector.broadcast %116 : vector<1x256xf32> to vector<4x256xf32>
    %119 = arith.mulf %117, %118 : vector<4x256xf32>
    %120 = arith.addf %110, %119 : vector<4x256xf32>
    %121 = vector.extract_strided_slice %3 {offsets = [0, 11], sizes = [4, 1], strides = [1, 1]} : vector<4x18xf32> to vector<4x1xf32>
    %122 = vector.extract_strided_slice %114 {offsets = [1, 0], sizes = [1, 256], strides = [1, 1]} : vector<2x256xf32> to vector<1x256xf32>
    %123 = vector.broadcast %121 : vector<4x1xf32> to vector<4x256xf32>
    %124 = vector.broadcast %122 : vector<1x256xf32> to vector<4x256xf32>
    %125 = arith.mulf %123, %124 : vector<4x256xf32>
    %126 = arith.addf %120, %125 : vector<4x256xf32>
    %c241_i32 = arith.constant 241 : i32
    %127 = tpu.dynamic_rotate %35 by %c241_i32 dim 1 : vector<2x256xf32>, i32 -> vector<2x256xf32>
    %c6 = arith.constant 6 : index
    %c0_14 = arith.constant 0 : index
    %128 = vector.load %arg2[%c6, %c0_14] : memref<9x256xf32, #tpu.memory_space<vmem>>, vector<1x256xf32>
    %129 = vector.broadcast %128 : vector<1x256xf32> to vector<2x256xf32>
    %130 = arith.mulf %127, %129 : vector<2x256xf32>
    %131 = vector.extract_strided_slice %3 {offsets = [0, 12], sizes = [4, 1], strides = [1, 1]} : vector<4x18xf32> to vector<4x1xf32>
    %132 = vector.extract_strided_slice %130 {offsets = [0, 0], sizes = [1, 256], strides = [1, 1]} : vector<2x256xf32> to vector<1x256xf32>
    %133 = vector.broadcast %131 : vector<4x1xf32> to vector<4x256xf32>
    %134 = vector.broadcast %132 : vector<1x256xf32> to vector<4x256xf32>
    %135 = arith.mulf %133, %134 : vector<4x256xf32>
    %136 = arith.addf %126, %135 : vector<4x256xf32>
    %137 = vector.extract_strided_slice %3 {offsets = [0, 13], sizes = [4, 1], strides = [1, 1]} : vector<4x18xf32> to vector<4x1xf32>
    %138 = vector.extract_strided_slice %130 {offsets = [1, 0], sizes = [1, 256], strides = [1, 1]} : vector<2x256xf32> to vector<1x256xf32>
    %139 = vector.broadcast %137 : vector<4x1xf32> to vector<4x256xf32>
    %140 = vector.broadcast %138 : vector<1x256xf32> to vector<4x256xf32>
    %141 = arith.mulf %139, %140 : vector<4x256xf32>
    %142 = arith.addf %136, %141 : vector<4x256xf32>
    %c240_i32 = arith.constant 240 : i32
    %143 = tpu.dynamic_rotate %35 by %c240_i32 dim 1 : vector<2x256xf32>, i32 -> vector<2x256xf32>
    %c7 = arith.constant 7 : index
    %c0_15 = arith.constant 0 : index
    %144 = vector.load %arg2[%c7, %c0_15] : memref<9x256xf32, #tpu.memory_space<vmem>>, vector<1x256xf32>
    %145 = vector.broadcast %144 : vector<1x256xf32> to vector<2x256xf32>
    %146 = arith.mulf %143, %145 : vector<2x256xf32>
    %147 = vector.extract_strided_slice %3 {offsets = [0, 14], sizes = [4, 1], strides = [1, 1]} : vector<4x18xf32> to vector<4x1xf32>
    %148 = vector.extract_strided_slice %146 {offsets = [0, 0], sizes = [1, 256], strides = [1, 1]} : vector<2x256xf32> to vector<1x256xf32>
    %149 = vector.broadcast %147 : vector<4x1xf32> to vector<4x256xf32>
    %150 = vector.broadcast %148 : vector<1x256xf32> to vector<4x256xf32>
    %151 = arith.mulf %149, %150 : vector<4x256xf32>
    %152 = arith.addf %142, %151 : vector<4x256xf32>
    %153 = vector.extract_strided_slice %3 {offsets = [0, 15], sizes = [4, 1], strides = [1, 1]} : vector<4x18xf32> to vector<4x1xf32>
    %154 = vector.extract_strided_slice %146 {offsets = [1, 0], sizes = [1, 256], strides = [1, 1]} : vector<2x256xf32> to vector<1x256xf32>
    %155 = vector.broadcast %153 : vector<4x1xf32> to vector<4x256xf32>
    %156 = vector.broadcast %154 : vector<1x256xf32> to vector<4x256xf32>
    %157 = arith.mulf %155, %156 : vector<4x256xf32>
    %158 = arith.addf %152, %157 : vector<4x256xf32>
    %c239_i32 = arith.constant 239 : i32
    %159 = tpu.dynamic_rotate %35 by %c239_i32 dim 1 : vector<2x256xf32>, i32 -> vector<2x256xf32>
    %c8 = arith.constant 8 : index
    %c0_16 = arith.constant 0 : index
    %160 = vector.load %arg2[%c8, %c0_16] : memref<9x256xf32, #tpu.memory_space<vmem>>, vector<1x256xf32>
    %161 = vector.broadcast %160 : vector<1x256xf32> to vector<2x256xf32>
    %162 = arith.mulf %159, %161 : vector<2x256xf32>
    %163 = vector.extract_strided_slice %3 {offsets = [0, 16], sizes = [4, 1], strides = [1, 1]} : vector<4x18xf32> to vector<4x1xf32>
    %164 = vector.extract_strided_slice %162 {offsets = [0, 0], sizes = [1, 256], strides = [1, 1]} : vector<2x256xf32> to vector<1x256xf32>
    %165 = vector.broadcast %163 : vector<4x1xf32> to vector<4x256xf32>
    %166 = vector.broadcast %164 : vector<1x256xf32> to vector<4x256xf32>
    %167 = arith.mulf %165, %166 : vector<4x256xf32>
    %168 = arith.addf %158, %167 : vector<4x256xf32>
    %169 = vector.extract_strided_slice %3 {offsets = [0, 17], sizes = [4, 1], strides = [1, 1]} : vector<4x18xf32> to vector<4x1xf32>
    %170 = vector.extract_strided_slice %162 {offsets = [1, 0], sizes = [1, 256], strides = [1, 1]} : vector<2x256xf32> to vector<1x256xf32>
    %171 = vector.broadcast %169 : vector<4x1xf32> to vector<4x256xf32>
    %172 = vector.broadcast %170 : vector<1x256xf32> to vector<4x256xf32>
    %173 = arith.mulf %171, %172 : vector<4x256xf32>
    %174 = arith.addf %168, %173 : vector<4x256xf32>
    %c0_17 = arith.constant 0 : index
    %c0_18 = arith.constant 0 : index
    %175 = vector.load %arg6[%c0_17, %c0_18] : memref<4x1xf32, #tpu.memory_space<vmem>>, vector<4x1xf32>
    %176 = vector.broadcast %175 : vector<4x1xf32> to vector<4x256xf32>
    %177 = arith.addf %174, %176 : vector<4x256xf32>
    %178 = arith.negf %177 : vector<4x256xf32>
    %179 = math.exp %178 : vector<4x256xf32>
    %cst_19 = arith.constant 1.000000e+00 : f32
    %180 = vector.broadcast %cst_19 : f32 to vector<4x256xf32>
    %181 = arith.addf %180, %179 : vector<4x256xf32>
    %182 = arith.divf %180, %181 : vector<4x256xf32>
    %183 = arith.mulf %177, %182 : vector<4x256xf32>
    %184 = arith.addf %1, %183 : vector<4x256xf32>
    %c0_20 = arith.constant 0 : index
    %c0_21 = arith.constant 0 : index
    %c0_22 = arith.constant 0 : index
    %185 = vector.load %arg7[%c0_20, %c0_21, %c0_22] : memref<1x4x256xf32, #tpu.memory_space<vmem>>, vector<1x4x256xf32>
    %186 = vector.shape_cast %185 : vector<1x4x256xf32> to vector<4x256xf32>
    %187 = vector.shape_cast %184 : vector<4x256xf32> to vector<1x4x256xf32>
    tpu.vector_store %arg7[%c0_20, %c0_21, %c0_22], %187 {strides = array<i32>} : memref<1x4x256xf32, #tpu.memory_space<vmem>>, vector<1x4x256xf32>,
    return
  }
  func.func @transform_0(%arg0: i32) -> (i32, i32, i32) {
    %c0_i32 = arith.constant 0 : i32
    %c0_i32_0 = arith.constant 0 : i32
    %c0_i32_1 = arith.constant 0 : i32
    return %arg0, %c0_i32, %c0_i32_0 : i32, i32, i32
  }
  func.func @transform_1(%arg0: i32) -> (i32, i32) {
    %c0_i32 = arith.constant 0 : i32
    %c0_i32_0 = arith.constant 0 : i32
    %c0_i32_1 = arith.constant 0 : i32
    return %c0_i32, %c0_i32_0 : i32, i32
  }
  func.func @transform_2(%arg0: i32) -> (i32, i32) {
    %c0_i32 = arith.constant 0 : i32
    %c0_i32_0 = arith.constant 0 : i32
    %c0_i32_1 = arith.constant 0 : i32
    return %c0_i32, %c0_i32_0 : i32, i32
  }
  func.func @transform_3(%arg0: i32) -> (i32, i32) {
    %c0_i32 = arith.constant 0 : i32
    %c0_i32_0 = arith.constant 0 : i32
    %c0_i32_1 = arith.constant 0 : i32
    return %c0_i32, %c0_i32_0 : i32, i32
  }
  func.func @transform_4(%arg0: i32) -> (i32, i32) {
    %c0_i32 = arith.constant 0 : i32
    %c0_i32_0 = arith.constant 0 : i32
    %c0_i32_1 = arith.constant 0 : i32
    return %c0_i32, %c0_i32_0 : i32, i32
  }
  func.func @transform_5(%arg0: i32) -> (i32, i32) {
    %c0_i32 = arith.constant 0 : i32
    %c0_i32_0 = arith.constant 0 : i32
    %c0_i32_1 = arith.constant 0 : i32
    return %c0_i32, %c0_i32_0 : i32, i32
  }
  func.func @transform_6(%arg0: i32) -> (i32, i32, i32) {
    %c0_i32 = arith.constant 0 : i32
    %c0_i32_0 = arith.constant 0 : i32
    %c0_i32_1 = arith.constant 0 : i32
    return %arg0, %c0_i32, %c0_i32_0 : i32, i32, i32
  }
}

</mosaic_0001>

<bundles_post_ra>
// kernel: tpu_custom_call.1
= control target key start
LH: loop header
LB: loop body
LE: loop exit
PB: predicated region body
PF: predicated region fallthrough
CT: control target
= control target key end

     0   :  { %11 = vsyncpa [#allocation3], 0  ;;  %s1742_s0 = inlined_call_operand.hbm [shape: f32[2,4,256], index: 0, kind: input, shape index: {}]   ;;  %s1743_s1 = inlined_call_operand.hbm [shape: f32[9,256], index: 1, kind: input, shape index: {}]   ;;  %s1744_s2 = inlined_call_operand.vmem [shape: f32[2,4], index: 2, kind: input, shape index: {}]   ;;  %s1745_s3 = inlined_call_operand.vmem [shape: f32[2,1], index: 3, kind: input, shape index: {}]   ;;  %s1746_s4 = inlined_call_operand.vmem [shape: f32[4,18], index: 4, kind: input, shape index: {}]   ;;  %s1747_s5 = inlined_call_operand.vmem [shape: f32[4,1], index: 5, kind: input, shape index: {}]   ;;  %s1748_s6 = inlined_call_operand.hbm [shape: f32[2,4,256], index: 6, kind: output, shape index: {}]  }
   0x1   :  { %13 = vsyncpa [#allocation3 + $0x1], 0 }
   0x2   :  { %14 = vsyncpa [#allocation6], 0 }
   0x3   :  { %15 = vsyncpa [#allocation4], 0 }
   0x4   :  { %17 = vsyncpa [#allocation4 + $0x1], 0  ;;  %s1342_s21 = smov 0   ;;  %s1344_s22 = smov 0  }
   0x5   :  { %s1346_s23 = smov 0   ;;  %s1348_s24 = smov 0  }
   0x6 LB: > { %s1363_s25 = sadd.s32 4294967295, %s1274_s24   ;;  %s999_s26 = sadd.s32 4294967294, %s1274_s24   ;;  %s1274_s24 = sphi %s1348_s24, %s1768_s24   ;;  %s1270_s23 = sphi %s1346_s23, %s1767_s23   ;;  %s1266_s22 = sphi %s1344_s22, %s1766_s22   ;;  %s1262_s21 = sphi %s1342_s21, %s1765_s21  }
   0x7   : > { %p43_p0 = scmp.ne.s32.totalorder %s1266_s22, %s1262_s21  ;;  %p1749_p1 = scmp.eq.s32.totalorder %s1363_s25, 0 }
   0x8   : > { %p178_p3 = scmp.eq.s32.totalorder %s999_s26, 1  ;;  %p1000_p5 = scmp.ge.s32.totalorder %s1274_s24, 1 }
   0x9   : > { %p1372_p4 = por %p1749_p1, %p43_p0  ;;  %p185_p7 = scmp.lt.s32.totalorder %s1274_s24, 3 }
   0xa   : > { %p1377_p6 = por %p178_p3, %p43_p0  ;;  %s1276_s30 = smov [#allocation5]  }
   0xb   : > { %s1752_s27 = scalar_select %p1372_p4, 1, 0 }
   0xc   : > { %s1753_s28 = scalar_select %p1377_p6, 1, 0 }
   0xd   : > { %p1382_p8 = pnand %p1000_p5, %p185_p7  ;;  %s197_s7 = sshll.u32 %s1276_s30, 4  ;;  %s1386_s7 = int_to_ptr.vmem [resolvable:$true] %s197_s7 }
   0xe   : > { %s1398_s9 = sadd.s32 1, %s1274_s24   ;;  %s30_s10 = sadd.s32 1, %s1270_s23 }
   0xf   : > { %s1754_s29 = scalar_select %p1382_p8, 1, 0 }
  0x10   : > { %p1029_p9 = pneg %p1382_p8  ;;  %s27_s11 = ssub.s32 %s1274_s24, %s1398_s9 }
  0x11   : > { %s1146_s14 = scalar_lea.hbm %s1743_s1, 512 }
  0x12   : > { %p1393_p11 = pnand %p1029_p9, %p1749_p1  ;;  %p1147_p12 = scmp.ne.s32.totalorder %s1743_s1, %s1146_s14 }
  0x13   : > { %p1153_p5 = scmp.lt.u32.totalorder %s1146_s14, %s1743_s1 }
  0x14   : > { %p1148_p13 = pneg %p1393_p11 }
  0x16   : > { %p1149_p0 = pnand %p1148_p13, %p1147_p12 }
  0x18   : > { %p1150_p3 = pneg %p1149_p0 }
  0x1a   : > { %p1155_p7 = pnand %p1153_p5, %p1150_p3 }
  0x1c   : > { %1158 = shalt.err (!%p1155_p7)
}
  0x1d   : > { %s1159_s19 = scalar_lea.vmem %s1386_s7, 512  ;;  %p1167_p2 = scmp.lt.s32.totalorder %s1386_s7, %s1386_s7 }
  0x1e   : > { %p1160_p9 = scmp.ne.s32.totalorder %s1386_s7, %s1159_s19  ;;  %p1168_p6 = scmp.lt.s32.totalorder %s1159_s19, %s1159_s19 }
  0x20   : > { %p1162_p10 = pnand %p1160_p9, %p1148_p13  ;;  %p1169_p4 = por %p1168_p6, %p1167_p2 }
  0x22   : > { %p1163_p1 = pneg %p1162_p10 }
  0x24   : > { %p1170_p8 = pnand %p1169_p4, %p1163_p1 }
  0x26   : > { %1173 = shalt.err (!%p1170_p8)
}
  0x27   : > { %s1277_s20 = smov 256   ;;  %s1278_s26 = smov 16  }
  0x28   : > { %1032 = dma.hbm_to_vmem [thread:$0]  (!%p1393_p11), %s1743_s1, 512, %s1386_s7, [#allocation6], %s1277_s20, %s1277_s20, %s1278_s26  }
  0x29   : > { %p28_p2 = scmp.eq.s32.totalorder %s27_s11, 0  ;;  %p37_p1 = scmp.ne.s32.totalorder %s1270_s23, %s1266_s22 }
  0x2a   : > { %p38_p4 = scmp.eq.s32.totalorder %s1274_s24, 0  ;;  %p1042_p6 = scmp.lt.s32.totalorder %s1274_s24, 2 }
  0x2b   : > { %s1429_s13 = scalar_select %p28_p2, %s1270_s23, %s30_s10  }
  0x2c   : > { %p39_p8 = por %p38_p4, %p37_p1  ;;  %p1756_p10 = scmp.eq.s32.totalorder %s1363_s25, 1 }
  0x2d   : > { %s223_s15 = sand.u32 1, %s1270_s23   ;;  %s1019_s16 = sshll.u32 %s1274_s24, 7 }
  0x2e   : > { %p1433_p12 = por %p1756_p10, %p37_p1  ;;  %s1003_s17 = sshll.u32 %s223_s15, 3 }
  0x2f   : > { %s1442_s19 = scalar_lea.hbm %s1742_s0, %s1019_s16  ;;  %s227_s7 = scalar_lea.vmem [#allocation2], %s1003_s17 }
  0x30   : > { %s235_s10 = sshll.u32 %s227_s7, 4  ;;  %p1444_p11 = pnand %p1042_p6, %p39_p8  ;;  %s1448_s10 = int_to_ptr.vmem [resolvable:$true] %s235_s10 }
  0x31   : > { %s224_s20 = scalar_lea.sflag [#allocation3], %s223_s15  ;;  %s1174_s26 = scalar_lea.hbm %s1442_s19, 128 }
  0x32   : > { %p1175_p13 = scmp.ne.s32.totalorder %s1442_s19, %s1174_s26  ;;  %p1176_p0 = pneg %p1444_p11 }
  0x33   : > { %s1179_s16 = scalar_lea.hbm %s1742_s0, 256  ;;  %p1180_p7 = scmp.lt.u32.totalorder %s1442_s19, %s1742_s0 }
  0x34   : > { %p1177_p3 = pnand %p1176_p0, %p1175_p13  ;;  %p1181_p9 = scmp.lt.u32.totalorder %s1179_s16, %s1174_s26 }
  0x35   : > { %p1183_p1 = scmp.lt.u32.totalorder %s1174_s26, %s1442_s19 }
  0x36   : > { %p1178_p5 = pneg %p1177_p3  ;;  %p1182_p2 = por %p1181_p9, %p1180_p7 }
  0x38   : > { %p1184_p4 = por %p1183_p1, %p1182_p2 }
  0x3a   : > { %p1185_p6 = pnand %p1184_p4, %p1178_p5 }
  0x3c   : > { %1188 = shalt.err (!%p1185_p6)
}
  0x3d   : > { %s1189_s15 = scalar_lea.vmem %s1448_s10, 128  ;;  %s1279_s18 = smov [#allocation2]  }
  0x3e   : > { %p1190_p8 = scmp.ne.s32.totalorder %s1448_s10, %s1189_s15  ;;  %s1194_s7 = sshll.u32 %s1279_s18, 4  ;;  %s1195_s7 = int_to_ptr.vmem [resolvable:$false] %s1194_s7 }
  0x3f   : > { %s1196_s30 = scalar_lea.vmem %s1195_s7, 256  ;;  %p1197_p3 = scmp.lt.s32.totalorder %s1448_s10, %s1195_s7 }
  0x40   : > { %p1192_p10 = pnand %p1190_p8, %p1176_p0  ;;  %p1198_p7 = scmp.lt.s32.totalorder %s1196_s30, %s1189_s15 }
  0x42   : > { %p1193_p13 = pneg %p1192_p10  ;;  %p1199_p9 = por %p1198_p7, %p1197_p3 }
  0x44   : > { %p1200_p2 = pnand %p1199_p9, %p1193_p13 }
  0x46   : > { %1203 = shalt.err (!%p1200_p2)
}
  0x47   : > { %1036 = dma.hbm_to_vmem [thread:$0]  (!%p1444_p11), %s1442_s19, 128, %s1448_s10, %s224_s20  }
  0x48   : > { %p1759_p5 = scmp.ne.s32.totalorder %s1754_s29, 0 }
  0x49   : > { %s1478_s26 = sand.u32 (!%p1759_p5), 1, %s1266_s22   ;;  %p1760_p0 = scmp.ne.s32.totalorder (!%p1759_p5), %s1752_s27, 0 }
  0x4a   : > { %244 = sbr.rel (%p1759_p5) target bundleno = 490 (0x1ea), region = 44  ;;  %s1007_s12 = sshll.u32 (!%p1759_p5), %s1478_s26, 3 }
  0x4b   : > { %s247_s16 = scalar_lea.sflag (!%p1759_p5), [#allocation3], %s1478_s26  ;;  %s1484_s17 = scalar_lea.vmem (!%p1759_p5), [#allocation2], %s1007_s12 }
  0x51   : > { %1249 = dma.done.wait (%p1760_p0), %s247_s16, 128  }
  0x52   : > { %1251 = vsyncadd (%p1760_p0), %s247_s16, 4294967168  ;;  %p1761_p11 = scmp.eq.s32.totalorder %s1363_s25, 0 }
  0x54   : > { %1253 = dma.done.wait (%p1761_p11), [#allocation6], 512   ;;  %p1762_p1 = pmov %p1761_p11 }
  0x55   : > { %v1280_v0 = vmov 0   ;;  %v1281_v1 = vmov 2   ;;  %v284_v2 = vld [vmem:[%s1744_s2] sm:$0x3]  ;;  %v1282_v3 = vmov 1   ;;  %v1283_v4 = vmov 3  }
  0x56   : > { %1255 = vsyncadd (%p1762_p1), [#allocation6], 4294966784  ;;  %1106 = vset.pattern.permute.xlu0 %v1280_v0  ;;  %1108 = vset.pattern.permute.xlu1 %v1281_v1  ;;  %v390_v5 = vld [vmem:[%s1745_s3] sm:$0x3]  ;;  %v1284_v7 = vmov 6   ;;  %v1285_v8 = vmov 4   ;;  %v292_v19 = vlaneseq }
  0x57   : > { %288 = vperm.xlu0 %1106, %v284_v2   ;;  %339 = vperm.xlu1 %1108, %v284_v2   ;;  %v1505_v6 = vld [vmem:[%s1746_s4] sm:$0xf]  ;;  %v1286_v9 = vmov 7   ;;  %v1287_v10 = vmov 5   ;;  %v1288_v11 = vmov 10   ;;  %v1289_v12 = vmov 8  }
  0x58   : > { %v1290_v13 = vmov 11   ;;  %v1291_v14 = vmov 9   ;;  %v1292_v15 = vmov 12   ;;  %v1293_v16 = vmov 13   ;;  %v1528_v25 = vld [vmem:[%s1484_s17] sm:$0xff]  ;;  %s1296_s8 = smov 17  }
  0x59   : > { %v1294_v17 = vmov 14   ;;  %v1295_v18 = vmov 16   ;;  %v293_v20 = vshrl.u32 %v292_v19, 7  ;;  %s1297_s15 = smov 16   ;;  %s1298_s18 = smov 15  }
  0x5a   : > { %s1299_s7 = smov 1   ;;  %s1300_s30 = smov 113  }
  0x5b   : > { %1107 = vset.pattern.permute.xlu0 %v1282_v3  ;;  %1109 = vset.pattern.permute.xlu1 %v1283_v4  ;;  %v1523_v21 = vsub.s32 0, %v293_v20  ;;  %v298_v22 = vsub.s32 4, %v293_v20  ;;  %v1525_v23 = vsub.s32 1, %v293_v20  ;;  %v322_v24 = vsub.s32 5, %v293_v20  ;;  %s1302_s16 = smov 127   ;;  %s1303_s17 = smov 111  }
  0x5c   : > { %313 = vperm.xlu0 %1107, %v284_v2   ;;  %365 = vperm.xlu1 %1109, %v284_v2   ;;  %v344_v26 = vsub.s32 2, %v293_v20  ;;  %v348_v27 = vsub.s32 6, %v293_v20  ;;  %v370_v28 = vsub.s32 3, %v293_v20  ;;  %v374_v29 = vsub.s32 7, %v293_v20  ;;  %s1304_s27 = smov 112   ;;  %s1020_s10 = sshll.u32 %s1363_s25, 7 }
  0x5d   : > { %v295_v30 = vrot.slane %v1528_v25, %v1523_v21  ;;  %v299_v31 = vrot.slane %v1528_v25, %v298_v22  ;;  %v319_v32 = vrot.slane %v1528_v25, %v1525_v23  ;;  %v323_v33 = vrot.slane %v1528_v25, %v322_v24  ;;  %s282_s11 = scalar_lea.vmem [#allocation7], %s1007_s12  ;;  %s1306_s25 = smov [#allocation7]  }
  0x5e   : > { %v345_v34 = vrot.slane %v1528_v25, %v344_v26  ;;  %v349_v35 = vrot.slane %v1528_v25, %v348_v27  ;;  %v371_v38 = vrot.slane %v1528_v25, %v370_v28  ;;  %v375_v39 = vrot.slane %v1528_v25, %v374_v29  ;;  %s919_s20 = sshll.u32 %s282_s11, 4  ;;  %s1208_s12 = sshll.u32 %s1306_s25, 4  ;;  %s1700_s20 = int_to_ptr.vmem [resolvable:$true] %s919_s20  ;;  %s1209_s12 = int_to_ptr.vmem [resolvable:$false] %s1208_s12 }
  0x5f   : > { %v305_v40 = vrot.slane %v295_v30, %v1523_v21  ;;  %v309_v41 = vrot.slane %v299_v31, %v1523_v21  ;;  %v329_v42 = vrot.slane %v319_v32, %v1525_v23  ;;  %v333_v43 = vrot.slane %v323_v33, %v1525_v23  ;;  %p1211_p10 = scmp.lt.s32.totalorder %s1700_s20, %s1209_s12 }
  0x60   : > { %1110 = vset.pattern.permute.xlu1 %v1280_v0  ;;  %1111 = vset.pattern.permute.xlu0 %v1280_v0  ;;  %v355_v44 = vrot.slane %v345_v34, %v344_v26  ;;  %v359_v45 = vrot.slane %v349_v35, %v344_v26  ;;  %v381_v46 = vrot.slane %v371_v38, %v370_v28  ;;  %v1595_v34 = vand.u32 127, %v292_v19  ;;  %v421_v35 = vld [vmem:[#allocation5] ss:$8 sm:$0x3] }
  0x61   : > { %393 = vperm.xlu1 %1110, %v390_v5   ;;  %437 = vperm.xlu0 %1111, %v1505_v6   ;;  %v385_v47 = vrot.slane %v375_v39, %v370_v28 }
  0x62   : > { %vm418_vm0 = vcmp.lt.s32.totalorder %v1595_v34, 17  ;;  %vm470_vm1 = vcmp.lt.s32.totalorder %v1595_v34, 16  ;;  %vm524_vm2 = vcmp.lt.s32.totalorder %v1595_v34, 15  ;;  %vm578_vm3 = vcmp.lt.s32.totalorder %v1595_v34, 1 }
  0x63   : > { %vm664_vm4 = vcmp.lt.s32.totalorder %v1595_v34, 127  ;;  %vm718_vm5 = vcmp.lt.s32.totalorder %v1595_v34, 113  ;;  %vm772_vm6 = vcmp.lt.s32.totalorder %v1595_v34, 112  ;;  %vm826_vm7 = vcmp.lt.s32.totalorder %v1595_v34, 111 }
  0x65   : > { %1112 = vset.pattern.permute.xlu1 %v1282_v3  ;;  %1114 = vset.pattern.permute.xlu0 %v1283_v4 }
  0x66   : > { %451 = vperm.xlu1 %1112, %v1505_v6   ;;  %505 = vperm.xlu0 %1114, %v1505_v6  }
  0x6a   : > { %1113 = vset.pattern.permute.xlu1 %v1281_v1  ;;  %1117 = vset.pattern.permute.xlu0 %v1284_v7 }
  0x6b   : > { %489 = vperm.xlu1 %1113, %v1505_v6   ;;  %597 = vperm.xlu0 %1117, %v1505_v6  }
  0x6f   : > { %1115 = vset.pattern.permute.xlu1 %v1285_v8  ;;  %1118 = vset.pattern.permute.xlu0 %v1286_v9 }
  0x70   : > { %543 = vperm.xlu1 %1115, %v1505_v6   ;;  %613 = vperm.xlu0 %1118, %v1505_v6  }
  0x74   : > { %1116 = vset.pattern.permute.xlu1 %v1287_v10  ;;  %1121 = vset.pattern.permute.xlu0 %v1288_v11 }
  0x75   : > { %559 = vperm.xlu1 %1116, %v1505_v6   ;;  %683 = vperm.xlu0 %1121, %v1505_v6  }
  0x79   : > { %1119 = vset.pattern.permute.xlu1 %v1289_v12  ;;  %1122 = vset.pattern.permute.xlu0 %v1290_v13 }
  0x7a   : > { %629 = vperm.xlu1 %1119, %v1505_v6   ;;  %699 = vperm.xlu0 %1122, %v1505_v6  }
  0x7e   : > { %1120 = vset.pattern.permute.xlu1 %v1291_v14  ;;  %1125 = vset.pattern.permute.xlu0 %v1294_v17  ;;  %v1305_v17 = vmov 17  }
  0x7f   : > { %645 = vperm.xlu1 %1120, %v1505_v6  }
  0x83   : > { %1123 = vset.pattern.permute.xlu1 %v1292_v15  ;;  %v1301_v15 = vmov 15  }
  0x84   : > { %737 = vperm.xlu1 %1123, %v1505_v6  }
  0x88   : > { %1124 = vset.pattern.permute.xlu1 %v1293_v16  ;;  %v876_v16 = vld [vmem:[%s1747_s5] sm:$0xf] }
  0x89   : > { %753 = vperm.xlu1 %1124, %v1505_v6  }
  0x8d   : > { %1127 = vset.pattern.permute.xlu1 %v1295_v18 }
  0xd6   : > { %v289_v36 = vpop.permute.xlu0 %288  ;;  %v340_v37 = vpop.permute.xlu1 %339 }
  0xd7   : > { %v310_v50 = vmul.f32 %v305_v40, %v289_v36  ;;  %v311_v51 = vmul.f32 %v309_v41, %v289_v36  ;;  %v360_v54 = vmul.f32 %v355_v44, %v340_v37  ;;  %v361_v55 = vmul.f32 %v359_v45, %v340_v37  ;;  %v474_v40 = vld [vmem:[#allocation5 + $0x1] ss:$8 sm:$0x3] }
  0xd8   : > { %v426_v36 = vrot.slane %v421_v35, %v1523_v21  ;;  %v430_v37 = vrot.slane %v421_v35, %v1525_v23  ;;  %v479_v45 = vrot.slane %v474_v40, %v1523_v21  ;;  %v483_v19 = vrot.slane %v474_v40, %v1525_v23 }
  0xdb   : > { %v314_v48 = vpop.permute.xlu0 %313  ;;  %v366_v49 = vpop.permute.xlu1 %365 }
  0xdc   : > { %v334_v52 = vmul.f32 %v329_v42, %v314_v48  ;;  %v335_v53 = vmul.f32 %v333_v43, %v314_v48  ;;  %v386_v58 = vmul.f32 %v381_v46, %v366_v49  ;;  %v387_v59 = vmul.f32 %v385_v47, %v366_v49 }
  0xde   : > { %v336_v56 = vadd.f32 %v334_v52, %v310_v50  ;;  %v337_v57 = vadd.f32 %v335_v53, %v311_v51  ;;  %v528_v52 = vld [vmem:[#allocation5 + $0x2] ss:$8 sm:$0x3] }
  0xe0   : > { %v362_v60 = vadd.f32 %v360_v54, %v336_v56  ;;  %v363_v61 = vadd.f32 %v361_v55, %v337_v57  ;;  %v394_v62 = vpop.permute.xlu1 %393  ;;  %v438_v20 = vpop.permute.xlu0 %437 }
  0xe2   : > { %v388_v63 = vadd.f32 %v386_v58, %v362_v60  ;;  %v389_v1 = vadd.f32 %v387_v59, %v363_v61  ;;  %v533_v59 = vrot.slane %v528_v52, %v1523_v21  ;;  %v537_v60 = vrot.slane %v528_v52, %v1525_v23 }
  0xe4   : > { %v396_v2 = vadd.f32 %v394_v62, %v388_v63  ;;  %v397_v3 = vadd.f32 %v394_v62, %v389_v1 }
  0xe5   : > { %v1574_v24 = vpop.permute.xlu0 %505 }
  0xe6   : > { %v1010_v4 = vmul.f32 -1.442695, %v396_v2  ;;  %v1011_v5 = vmul.f32 -1.442695, %v397_v3 }
  0xe8   : > { %1130 = vpow2.f32 %v1010_v4 }
  0xe9   : > { %1132 = vpow2.f32 %v1011_v5 }
  0xea   : > { %v1578_v27 = vpop.permute.xlu0 %597 }
  0xef   : > { %v1582_v29 = vpop.permute.xlu0 %613 }
  0xf2   : > { %v1131_v7 = vpop.eup %1130 }
  0xf3   : > { %v1133_v8 = vpop.eup %1132  ;;  %v404_v9 = vadd.f32 1.0, %v1131_v7  ;;  %v582_v7 = vld [vmem:[#allocation5 + $0x3] ss:$8 sm:$0x3] }
  0xf4   : > { %v405_v10 = vadd.f32 1.0, %v1133_v8 }
  0xf5   : > { %1134 = vrcp.f32 %v404_v9 }
  0xf6   : > { %1136 = vrcp.f32 %v405_v10 }
  0xff   : > { %v1135_v11 = vpop.eup %1134 }
 0x100   : > { %v1137_v12 = vpop.eup %1136  ;;  %v1544_v13 = vmul.f32 %v1135_v11, %v396_v2 }
 0x101   : > { %v1546_v14 = vmul.f32 %v1137_v12, %v397_v3 }
 0x102   : > { %412 = vrot.lane.b32.xlu1 %v1544_v13, %s1296_s8 }
 0x103   : > { %414 = vrot.lane.b32.xlu0 %v1546_v14, %s1296_s8 }
 0x106   : > { %468 = vrot.lane.b32.xlu1 %v1546_v14, %s1297_s15 }
 0x107   : > { %466 = vrot.lane.b32.xlu0 %v1544_v13, %s1297_s15 }
 0x10a   : > { %520 = vrot.lane.b32.xlu1 %v1544_v13, %s1298_s18 }
 0x10b   : > { %522 = vrot.lane.b32.xlu0 %v1546_v14, %s1298_s18  ;;  %s1698_s18 = scalar_lea.hbm %s1748_s6, %s1020_s10 }
 0x10e   : > { %574 = vrot.lane.b32.xlu1 %v1544_v13, %s1299_s7 }
 0x10f   : > { %791 = vperm.xlu0 %1125, %v1505_v6  }
 0x112   : > { %576 = vrot.lane.b32.xlu1 %v1546_v14, %s1299_s7  ;;  %s905_s7 = scalar_lea.sflag [#allocation4], %s1478_s26 }
 0x113   : > { %716 = vrot.lane.b32.xlu0 %v1546_v14, %s1300_s30 }
 0x114   : > { %1126 = vset.pattern.permute.xlu0 %v1301_v15  ;;  %v587_v15 = vrot.slane %v582_v7, %v1523_v21 }
 0x116   : > { %660 = vrot.lane.b32.xlu1 %v1544_v13, %s1302_s16 }
 0x117   : > { %807 = vperm.xlu0 %1126, %v1505_v6  }
 0x11a   : > { %662 = vrot.lane.b32.xlu1 %v1546_v14, %s1302_s16  ;;  %s1210_s16 = scalar_lea.vmem %s1209_s12, 256 }
 0x11b   : > { %824 = vrot.lane.b32.xlu0 %v1546_v14, %s1303_s17 }
 0x11c   : > { %1129 = vset.pattern.permute.xlu0 %v1280_v0  ;;  %v452_v0 = vpop.permute.xlu1 %451 }
 0x11e   : > { %714 = vrot.lane.b32.xlu1 %v1544_v13, %s1300_s30  ;;  %s1204_s30 = scalar_lea.vmem %s1700_s20, 128 }
 0x11f   : > { %879 = vperm.xlu0 %1129, %v876_v16   ;;  %v591_v16 = vrot.slane %v582_v7, %v1525_v23  ;;  %p1205_p4 = scmp.ne.s32.totalorder %s1700_s20, %s1204_s30  ;;  %p1212_p13 = scmp.lt.s32.totalorder %s1210_s16, %s1204_s30 }
 0x120   : > { %v490_v18 = vpop.permute.xlu1 %489 }
 0x121   : > { %p1206_p6 = pnand %p1205_p4, %p1433_p12  ;;  %p1213_p3 = por %p1212_p13, %p1211_p10 }
 0x122   : > { %845 = vperm.xlu1 %1127, %v1505_v6  }
 0x123   : > { %p1207_p8 = pneg %p1206_p6 }
 0x124   : > { %v1572_v22 = vpop.permute.xlu1 %543 }
 0x125   : > { %p1214_p7 = pnand %p1213_p3, %p1207_p8 }
 0x126   : > { %768 = vrot.lane.b32.xlu1 %v1544_v13, %s1304_s27 }
 0x127   : > { %1128 = vset.pattern.permute.xlu1 %v1305_v17 }
 0x128   : > { %v1576_v26 = vpop.permute.xlu1 %559 }
 0x12a   : > { %770 = vrot.lane.b32.xlu1 %v1546_v14, %s1304_s27 }
 0x12c   : > { %v1580_v28 = vpop.permute.xlu1 %629 }
 0x12e   : > { %822 = vrot.lane.b32.xlu1 %v1544_v13, %s1303_s17 }
 0x130   : > { %v1584_v30 = vpop.permute.xlu1 %645 }
 0x132   : > { %861 = vperm.xlu1 %1128, %v1505_v6   ;;  %v1588_v6 = vpop.permute.xlu0 %683 }
 0x134   : > { %v1586_v31 = vpop.permute.xlu1 %737 }
 0x136   : > { %v1592_v33 = vpop.permute.xlu0 %699 }
 0x138   : > { %v1590_v32 = vpop.permute.xlu1 %753 }
 0x174   : > { %v413_v38 = vpop.permute.xlu1 %412 }
 0x175   : > { %v415_v39 = vpop.permute.xlu0 %414 }
 0x176   : > { %v419_v41 = vsel %vm418_vm0, %v413_v38, %v415_v39  ;;  %v420_v42 = vsel %vm418_vm0, %v415_v39, %v413_v38 }
 0x177   : > { %v433_v43 = vmul.f32 %v426_v36, %v420_v42  ;;  %v434_v44 = vmul.f32 %v430_v37, %v419_v41 }
 0x178   : > { %v469_v46 = vpop.permute.xlu1 %468 }
 0x179   : > { %v467_v47 = vpop.permute.xlu0 %466  ;;  %v443_v48 = vrot.slane %v433_v43, %v1523_v21  ;;  %v447_v49 = vrot.slane %v434_v44, %v1523_v21  ;;  %v457_v53 = vrot.slane %v433_v43, %v1525_v23  ;;  %v461_v54 = vrot.slane %v434_v44, %v1525_v23 }
 0x17a   : > { %v471_v50 = vsel %vm470_vm1, %v467_v47, %v469_v46  ;;  %v472_v51 = vsel %vm470_vm1, %v469_v46, %v467_v47 }
 0x17b   : > { %v486_v55 = vmul.f32 %v479_v45, %v472_v51  ;;  %v487_v56 = vmul.f32 %v483_v19, %v471_v50  ;;  %v448_v61 = vmul.f32 %v443_v48, %v438_v20  ;;  %v449_v62 = vmul.f32 %v447_v49, %v438_v20 }
 0x17c   : > { %v521_v57 = vpop.permute.xlu1 %520  ;;  %v462_v2 = vmul.f32 %v457_v53, %v452_v0  ;;  %v463_v3 = vmul.f32 %v461_v54, %v452_v0 }
 0x17d   : > { %v523_v58 = vpop.permute.xlu0 %522  ;;  %v495_v63 = vrot.slane %v486_v55, %v1523_v21  ;;  %v499_v1 = vrot.slane %v487_v56, %v1523_v21  ;;  %v511_v35 = vrot.slane %v486_v55, %v1525_v23  ;;  %v515_v0 = vrot.slane %v487_v56, %v1525_v23 }
 0x17e   : > { %v525_v4 = vsel %vm524_vm2, %v521_v57, %v523_v58  ;;  %v526_v5 = vsel %vm524_vm2, %v523_v58, %v521_v57  ;;  %v464_v17 = vadd.f32 %v462_v2, %v448_v61  ;;  %v465_v20 = vadd.f32 %v463_v3, %v449_v62 }
 0x17f   : > { %v500_v9 = vmul.f32 %v495_v63, %v490_v18  ;;  %v501_v10 = vmul.f32 %v499_v1, %v490_v18  ;;  %v540_v11 = vmul.f32 %v533_v59, %v526_v5  ;;  %v541_v12 = vmul.f32 %v537_v60, %v525_v4 }
 0x180   : > { %v575_v8 = vpop.permute.xlu1 %574  ;;  %v516_v42 = vmul.f32 %v511_v35, %v1574_v24  ;;  %v517_v43 = vmul.f32 %v515_v0, %v1574_v24 }
 0x181   : > { %v502_v37 = vadd.f32 %v500_v9, %v464_v17  ;;  %v503_v38 = vadd.f32 %v501_v10, %v465_v20  ;;  %v549_v39 = vrot.slane %v540_v11, %v1523_v21  ;;  %v553_v18 = vrot.slane %v541_v12, %v1523_v21  ;;  %v722_v20 = vld [vmem:[#allocation5 + $0x6] ss:$8 sm:$0x3] }
 0x182   : > { %v565_v50 = vrot.slane %v540_v11, %v1525_v23  ;;  %v569_v51 = vrot.slane %v541_v12, %v1525_v23  ;;  %v651_v17 = vrot.slane %v1544_v13, %v1525_v23 }
 0x183   : > { %v518_v19 = vadd.f32 %v516_v42, %v502_v37  ;;  %v519_v46 = vadd.f32 %v517_v43, %v503_v38  ;;  %v554_v47 = vmul.f32 %v549_v39, %v1572_v22  ;;  %v555_v48 = vmul.f32 %v553_v18, %v1572_v22  ;;  %v668_v22 = vld [vmem:[#allocation5 + $0x5] ss:$8 sm:$0x3] }
 0x184   : > { %v577_v36 = vpop.permute.xlu1 %576  ;;  %v570_v24 = vmul.f32 %v565_v50, %v1576_v26  ;;  %v571_v56 = vmul.f32 %v569_v51, %v1576_v26  ;;  %v673_v1 = vrot.slane %v668_v22, %v1523_v21  ;;  %v677_v2 = vrot.slane %v668_v22, %v1525_v23 }
 0x185   : > { %v579_v40 = vsel %vm578_vm3, %v575_v8, %v577_v36  ;;  %v580_v41 = vsel %vm578_vm3, %v577_v36, %v575_v8  ;;  %v556_v54 = vadd.f32 %v554_v47, %v518_v19  ;;  %v557_v55 = vadd.f32 %v555_v48, %v519_v46 }
 0x186   : > { %v594_v44 = vmul.f32 %v587_v15, %v580_v41  ;;  %v595_v45 = vmul.f32 %v591_v16, %v579_v40  ;;  %v639_v8 = vrot.slane %v1546_v14, %v1523_v21  ;;  %v655_v36 = vrot.slane %v1546_v14, %v1525_v23 }
 0x187   : > { %v572_v60 = vadd.f32 %v570_v24, %v556_v54  ;;  %v573_v61 = vadd.f32 %v571_v56, %v557_v55  ;;  %v731_v41 = vrot.slane %v722_v20, %v1525_v23 }
 0x188   : > { %v661_v49 = vpop.permute.xlu1 %660  ;;  %v603_v52 = vrot.slane %v594_v44, %v1523_v21  ;;  %v607_v53 = vrot.slane %v595_v45, %v1523_v21  ;;  %v619_v62 = vrot.slane %v594_v44, %v1525_v23  ;;  %v623_v63 = vrot.slane %v595_v45, %v1525_v23 }
 0x189   : > { %v641_v0 = vmul.f32 %v639_v8, %v1580_v28  ;;  %v657_v14 = vmul.f32 %v655_v36, %v1584_v30 }
 0x18a   : > { %v608_v57 = vmul.f32 %v603_v52, %v1578_v27  ;;  %v609_v58 = vmul.f32 %v607_v53, %v1578_v27  ;;  %v635_v27 = vrot.slane %v1544_v13, %v1523_v21  ;;  %v624_v9 = vmul.f32 %v619_v62, %v1582_v29 }
 0x18b   : > { %v625_v10 = vmul.f32 %v623_v63, %v1582_v29  ;;  %v727_v13 = vrot.slane %v722_v20, %v1523_v21 }
 0x18c   : > { %v663_v59 = vpop.permute.xlu1 %662  ;;  %v610_v3 = vadd.f32 %v608_v57, %v572_v60  ;;  %v611_v26 = vadd.f32 %v609_v58, %v573_v61  ;;  %v640_v35 = vmul.f32 %v635_v27, %v1580_v28  ;;  %v656_v28 = vmul.f32 %v651_v17, %v1584_v30  ;;  %v776_v30 = vld [vmem:[#allocation5 + $0x7] ss:$8 sm:$0x3] }
 0x18d   : > { %v665_v4 = vsel %vm664_vm4, %v661_v49, %v663_v59  ;;  %v666_v5 = vsel %vm664_vm4, %v663_v59, %v661_v49  ;;  %v781_v57 = vrot.slane %v776_v30, %v1523_v21  ;;  %v785_v58 = vrot.slane %v776_v30, %v1525_v23 }
 0x18e   : > { %v1636_v7 = vpop.permute.xlu0 %791  ;;  %v680_v11 = vmul.f32 %v673_v1, %v665_v4  ;;  %v681_v12 = vmul.f32 %v677_v2, %v666_v5  ;;  %v626_v15 = vadd.f32 %v624_v9, %v610_v3  ;;  %v627_v16 = vadd.f32 %v625_v10, %v611_v26 }
 0x190   : > { %v715_v37 = vpop.permute.xlu1 %714  ;;  %v689_v29 = vrot.slane %v680_v11, %v1523_v21  ;;  %v693_v39 = vrot.slane %v681_v12, %v1523_v21  ;;  %v642_v18 = vadd.f32 %v640_v35, %v626_v15  ;;  %v643_v40 = vadd.f32 %v641_v0, %v627_v16 }
 0x191   : > { %v705_v49 = vrot.slane %v680_v11, %v1525_v23  ;;  %v709_v50 = vrot.slane %v681_v12, %v1525_v23 }
 0x192   : > { %v717_v38 = vpop.permute.xlu0 %716  ;;  %v694_v44 = vmul.f32 %v689_v29, %v1588_v6  ;;  %v695_v45 = vmul.f32 %v693_v39, %v1588_v6  ;;  %v659_v19 = vadd.f32 %v657_v14, %v643_v40  ;;  %v658_v46 = vadd.f32 %v656_v28, %v642_v18 }
 0x193   : > { %v719_v42 = vsel %vm718_vm5, %v715_v37, %v717_v38  ;;  %v720_v43 = vsel %vm718_vm5, %v717_v38, %v715_v37  ;;  %v710_v24 = vmul.f32 %v705_v49, %v1592_v33  ;;  %v711_v6 = vmul.f32 %v709_v50, %v1592_v33  ;;  %v830_v33 = vld [vmem:[#allocation5 + $0x10] ss:$8 sm:$0x3] }
 0x194   : > { %v734_v47 = vmul.f32 %v727_v13, %v719_v42  ;;  %v735_v48 = vmul.f32 %v731_v41, %v720_v43  ;;  %v696_v52 = vadd.f32 %v694_v44, %v658_v46  ;;  %v697_v53 = vadd.f32 %v695_v45, %v659_v19 }
 0x195   : > { %v839_v11 = vrot.slane %v830_v33, %v1525_v23 }
 0x196   : > { %v743_v54 = vrot.slane %v734_v47, %v1523_v21  ;;  %v747_v55 = vrot.slane %v735_v48, %v1523_v21  ;;  %v712_v22 = vadd.f32 %v710_v24, %v696_v52  ;;  %v713_v59 = vadd.f32 %v711_v6, %v697_v53  ;;  %v808_v62 = vpop.permute.xlu0 %807 }
 0x197   : > { %v759_v63 = vrot.slane %v734_v47, %v1525_v23  ;;  %v763_v1 = vrot.slane %v735_v48, %v1525_v23 }
 0x198   : > { %v748_v60 = vmul.f32 %v743_v54, %v1586_v31  ;;  %v749_v61 = vmul.f32 %v747_v55, %v1586_v31  ;;  %v835_v31 = vrot.slane %v830_v33, %v1523_v21 }
 0x199   : > { %v764_v9 = vmul.f32 %v759_v63, %v1590_v32  ;;  %v765_v10 = vmul.f32 %v763_v1, %v1590_v32 }
 0x19a   : > { %v750_v4 = vadd.f32 %v748_v60, %v712_v22  ;;  %v751_v5 = vadd.f32 %v749_v61, %v713_v59  ;;  %v825_v12 = vpop.permute.xlu0 %824 }
 0x19c   : > { %v766_v36 = vadd.f32 %v764_v9, %v750_v4  ;;  %v767_v37 = vadd.f32 %v765_v10, %v751_v5 }
 0x19e   : > { %v880_v52 = vpop.permute.xlu0 %879 }
 0x1a1   : > { %v846_v51 = vpop.permute.xlu1 %845 }
 0x1a5   : > { %v769_v56 = vpop.permute.xlu1 %768 }
 0x1a9   : > { %v771_v2 = vpop.permute.xlu1 %770 }
 0x1aa   : > { %v773_v3 = vsel %vm772_vm6, %v769_v56, %v771_v2  ;;  %v774_v26 = vsel %vm772_vm6, %v771_v2, %v769_v56 }
 0x1ab   : > { %v788_v27 = vmul.f32 %v781_v57, %v773_v3  ;;  %v789_v8 = vmul.f32 %v785_v58, %v774_v26 }
 0x1ad   : > { %v797_v15 = vrot.slane %v788_v27, %v1523_v21  ;;  %v801_v16 = vrot.slane %v789_v8, %v1523_v21  ;;  %v813_v17 = vrot.slane %v788_v27, %v1525_v23  ;;  %v817_v20 = vrot.slane %v789_v8, %v1525_v23  ;;  %v823_v35 = vpop.permute.xlu1 %822 }
 0x1ae   : > { %v827_v0 = vsel %vm826_vm7, %v823_v35, %v825_v12  ;;  %v828_v32 = vsel %vm826_vm7, %v825_v12, %v823_v35 }
 0x1af   : > { %v802_v38 = vmul.f32 %v797_v15, %v1636_v7  ;;  %v803_v29 = vmul.f32 %v801_v16, %v1636_v7  ;;  %v842_v39 = vmul.f32 %v835_v31, %v827_v0  ;;  %v843_v18 = vmul.f32 %v839_v11, %v828_v32 }
 0x1b0   : > { %v818_v40 = vmul.f32 %v813_v17, %v808_v62  ;;  %v819_v13 = vmul.f32 %v817_v20, %v808_v62 }
 0x1b1   : > { %v804_v41 = vadd.f32 %v802_v38, %v766_v36  ;;  %v805_v42 = vadd.f32 %v803_v29, %v767_v37  ;;  %v851_v43 = vrot.slane %v842_v39, %v1523_v21  ;;  %v855_v28 = vrot.slane %v843_v18, %v1523_v21  ;;  %v862_v44 = vpop.permute.xlu1 %861 }
 0x1b2   : > { %v867_v14 = vrot.slane %v842_v39, %v1525_v23  ;;  %v871_v34 = vrot.slane %v843_v18, %v1525_v23 }
 0x1b3   : > { %v820_v45 = vadd.f32 %v818_v40, %v804_v41  ;;  %v821_v19 = vadd.f32 %v819_v13, %v805_v42  ;;  %v856_v46 = vmul.f32 %v851_v43, %v846_v51  ;;  %v857_v47 = vmul.f32 %v855_v28, %v846_v51 }
 0x1b4   : > { %v872_v7 = vmul.f32 %v867_v14, %v862_v44  ;;  %v873_v48 = vmul.f32 %v871_v34, %v862_v44 }
 0x1b5   : > { %v858_v49 = vadd.f32 %v856_v46, %v820_v45  ;;  %v859_v50 = vadd.f32 %v857_v47, %v821_v19 }
 0x1b7   : > { %v874_v53 = vadd.f32 %v872_v7, %v858_v49  ;;  %v875_v54 = vadd.f32 %v873_v48, %v859_v50 }
 0x1b9   : > { %v882_v55 = vadd.f32 %v880_v52, %v874_v53  ;;  %v883_v30 = vadd.f32 %v880_v52, %v875_v54 }
 0x1bb   : > { %v1012_v21 = vmul.f32 -1.442695, %v882_v55  ;;  %v1013_v24 = vmul.f32 -1.442695, %v883_v30 }
 0x1bd   : > { %1138 = vpow2.f32 %v1012_v21 }
 0x1be   : > { %1140 = vpow2.f32 %v1013_v24 }
 0x1c7   : > { %v1139_v23 = vpop.eup %1138 }
 0x1c8   : > { %v1141_v6 = vpop.eup %1140  ;;  %v890_v56 = vadd.f32 1.0, %v1139_v23 }
 0x1c9   : > { %v891_v51 = vadd.f32 1.0, %v1141_v6 }
 0x1ca   : > { %1142 = vrcp.f32 %v890_v56 }
 0x1cb   : > { %1144 = vrcp.f32 %v891_v51 }
 0x1d4   : > { %v1143_v57 = vpop.eup %1142 }
 0x1d5   : > { %v1145_v58 = vpop.eup %1144  ;;  %v896_v22 = vmul.f32 %v1143_v57, %v882_v55 }
 0x1d6   : > { %v897_v59 = vmul.f32 %v1145_v58, %v883_v30 }
 0x1d8   : > { %v900_v60 = vcombine.low %v896_v22, %v897_v59 }
 0x1da   : > { %v902_v61 = vadd.f32 %v900_v60, %v1528_v25 }
 0x1dc   : > { %903 = vst [vmem:[%s282_s11] sm:$0xff] %v902_v61 }
 0x1dd   : > { %1217 = shalt.err (!%p1214_p7)
}
 0x1de   : > { %s1218_s26 = scalar_lea.hbm %s1698_s18, 128  ;;  %s1222_s19 = scalar_lea.hbm %s1748_s6, 256 }
 0x1df   : > { %p1219_p9 = scmp.ne.s32.totalorder %s1698_s18, %s1218_s26  ;;  %p1223_p0 = scmp.lt.u32.totalorder %s1698_s18, %s1748_s6 }
 0x1e0   : > { %p1224_p11 = scmp.lt.u32.totalorder %s1222_s19, %s1218_s26  ;;  %p1226_p4 = scmp.lt.u32.totalorder %s1218_s26, %s1698_s18 }
 0x1e1   : > { %p1220_p2 = pnand %p1219_p9, %p1433_p12 }
 0x1e2   : > { %p1225_p1 = por %p1224_p11, %p1223_p0 }
 0x1e3   : > { %p1221_p5 = pneg %p1220_p2 }
 0x1e4   : > { %p1227_p6 = por %p1226_p4, %p1225_p1 }
 0x1e6   : > { %p1228_p8 = pnand %p1227_p6, %p1221_p5 }
 0x1e8   : > { %1231 = shalt.err (!%p1228_p8)
}
 0x1e9   : > { %1027 = dma.vmem_to_hbm [thread:$0]  (%p1433_p12), %s1700_s20, 128, %s1698_s18, %s905_s7  }
 0x1ea PF: > { %s931_s11 = sand.u32 1, %s1262_s21   ;;  %p1763_p10 = scmp.ne.s32.totalorder %s1753_s28, 0 }
 0x1eb   : > { %p1764_p13 = scmp.ge.s32.totalorder %s1274_s24, 2  ;;  %s932_s8 = scalar_lea.sflag [#allocation4], %s931_s11 }
 0x1ed   : > { %p1038_p3 = pnand %p1764_p13, %p1763_p10 }
 0x1ef   : > { %1257 = dma.done.wait (!%p1038_p3), %s932_s8, 128  }
 0x1f0   : > { %1259 = vsyncadd (!%p1038_p3), %s932_s8, 4294967168  ;;  %p20_p7 = scmp.ge.s32.totalorder %s1398_s9, 4   ;;  %s1765_s21 = smov %s1266_s22 }
 0x1f1   : > { %s1766_s22 = smov %s1270_s23  ;;  %s1767_s23 = smov %s1429_s13 }
 0x1f2   : > { %s1768_s24 = smov %s1398_s9  ;;  %22 = sbr.rel (!%p20_p7) target bundleno = 6 (0x6), region = 100 }
 0x1f9   :  { %937 = vsyncpa [#allocation3], 1 }
 0x1fa   :  { %939 = vsyncpa [#allocation3 + $0x1], 1 }
 0x1fb   :  { %940 = vsyncpa [#allocation6], 1 }
 0x1fc   :  { %941 = vsyncpa [#allocation4], 1 }
 0x1fd   :  { %943 = vsyncpa [#allocation4 + $0x1], 1 }

</bundles_post_ra>
